<compile_context>
chip_gen: v7x
topology: tpu7x:2x2x1
jax: 0.10.0
libtpu: 0.0.40
codegen_flags: <defaults>
</compile_context>

<pallas_src>
import functools

import numpy as np
import jax
import jax.numpy as jnp
from jax import lax
from jax.experimental import pallas as pl
from jax.experimental.pallas import tpu as pltpu

LANE = 128


# --------------------------------------------------------------------------
# small helpers
# --------------------------------------------------------------------------

def _ceil_to(x, m):
    return (x + m - 1) // m * m


def _halo(w):
    # Zero-halo rows on each side of the flattened activation.  >= W+1 so every
    # 3x3 tap offset stays in bounds; rounded up to 8 so the interior store is
    # sublane-aligned.
    return _ceil_to(w + 1, 8)


def _full_spec(shape):
    zeros = (0,) * len(shape)
    return pl.BlockSpec(shape, lambda i: zeros)


def _row_tile(m):
    for t in (256, 128):
        if m > t and m % t == 0:
            return t
    return m                      # whole-array block (legal for any M)


@functools.lru_cache(maxsize=None)
def _stencil_masks(n, h, w):
    """[9, n*h*w, 1] f32: 1.0 where 3x3 tap (dy,dx) falls inside the image."""
    hh, ww = np.meshgrid(np.arange(h), np.arange(w), indexing='ij')
    hh = np.tile(hh.reshape(1, h * w), (n, 1)).reshape(-1)
    ww = np.tile(ww.reshape(1, h * w), (n, 1)).reshape(-1)
    masks = []
    for dy in range(3):
        for dx in range(3):
            ok = ((hh + dy - 1 >= 0) & (hh + dy - 1 < h) &
                  (ww + dx - 1 >= 0) & (ww + dx - 1 < w))
            masks.append(ok.astype(np.float32))
    return jnp.asarray(np.stack(masks, 0)[:, :, None])


# --------------------------------------------------------------------------
# Pallas kernels
# --------------------------------------------------------------------------

def _pw_relu_kernel(x_ref, w_ref, b_ref, o_ref):
    acc = jnp.dot(x_ref[...].astype(jnp.bfloat16), w_ref[...],
                  preferred_element_type=jnp.float32)
    o_ref[...] = jnp.maximum(acc + b_ref[...], 0.0)


def _pw_kernel(x_ref, w_ref, b_ref, o_ref):
    acc = jnp.dot(x_ref[...].astype(jnp.bfloat16), w_ref[...],
                  preferred_element_type=jnp.float32)
    o_ref[...] = acc + b_ref[...]


def pointwise_conv(x, p, relu=True):
    """Fused (x @ w) + bias (+ReLU).  x: [M, Kp] f32, w: [Kp, Np] bf16."""
    m, kp = x.shape
    assert kp == p['w'].shape[0], (kp, p['w'].shape)
    np_ = p['w'].shape[1]
    tm = _row_tile(m)
    kern = _pw_relu_kernel if relu else _pw_kernel
    return pl.pallas_call(
        kern,
        out_shape=jax.ShapeDtypeStruct((m, np_), jnp.float32),
        grid=(m // tm,),
        in_specs=[pl.BlockSpec((tm, kp), lambda i: (i, 0)),
                  pl.BlockSpec((kp, np_), lambda i: (0, 0)),
                  pl.BlockSpec((1, np_), lambda i: (0, 0))],
        out_specs=pl.BlockSpec((tm, np_), lambda i: (i, 0)),
        compiler_params=pltpu.CompilerParams(
            dimension_semantics=("parallel",)),
    )(x, p['w'], p['b'])


def _dw_taps(buf, masks_ref, m, w, halo):
    """Masked 3x3 neighbour slices of the zero-haloed flattened activation."""
    taps = []
    for dy in range(3):
        for dx in range(3):
            t = dy * 3 + dx
            off = (dy - 1) * w + (dx - 1)
            taps.append((t, buf[halo + off:halo + off + m, :] * masks_ref[t]))
    return taps


def _make_branch_kernel(n, h, w, pre_pw):
    """One InvertedResidual branch, fully fused in VMEM:
       (optional 1x1+BN+ReLU) -> 3x3 depthwise+BN (stride 1) -> 1x1+BN+ReLU."""
    m = n * h * w
    halo = _halo(w)

    def _tail(y, wd_ref, bd_ref, w3_ref, b3_ref, masks_ref, o_ref, buf):
        buf[...] = jnp.zeros_like(buf)           # zero halo
        buf[halo:halo + m, :] = y                # interior = branch activation
        acc = None
        for t, tap in _dw_taps(buf, masks_ref, m, w, halo):
            tap = tap * wd_ref[t]                # per-channel (lane) weights
            acc = tap if acc is None else acc + tap
        z = acc + bd_ref[...]                    # folded-BN bias, no ReLU
        out = jnp.dot(z.astype(jnp.bfloat16), w3_ref[...],
                      preferred_element_type=jnp.float32) + b3_ref[...]
        o_ref[...] = jnp.maximum(out, 0.0)

    if pre_pw:
        def kernel(x_ref, w1_ref, b1_ref, wd_ref, bd_ref, w3_ref, b3_ref,
                   masks_ref, o_ref, buf):
            y = jnp.dot(x_ref[...].astype(jnp.bfloat16), w1_ref[...],
                        preferred_element_type=jnp.float32) + b1_ref[...]
            y = jnp.maximum(y, 0.0)
            _tail(y, wd_ref, bd_ref, w3_ref, b3_ref, masks_ref, o_ref, buf)
    else:
        def kernel(x_ref, wd_ref, bd_ref, w3_ref, b3_ref,
                   masks_ref, o_ref, buf):
            _tail(x_ref[...], wd_ref, bd_ref, w3_ref, b3_ref, masks_ref,
                  o_ref, buf)
    return kernel


def _make_maxpool_kernel(n, h, w):
    m = n * h * w
    halo = _halo(w)

    def kernel(x_ref, masks_ref, o_ref, buf):
        buf[...] = jnp.zeros_like(buf)
        buf[halo:halo + m, :] = x_ref[...]
        acc = None
        for _, tap in _dw_taps(buf, masks_ref, m, w, halo):
            acc = tap if acc is None else jnp.maximum(acc, tap)
        o_ref[...] = acc
    return kernel


# --------------------------------------------------------------------------
# wrappers around the kernels (layout glue kept tiny)
# --------------------------------------------------------------------------

def _decimate(x, nhw):
    """Take every other spatial position (stride-2 output from a stride-1 map)."""
    n, h, w = nhw
    cp = x.shape[1]
    ho, wo = (h - 1) // 2 + 1, (w - 1) // 2 + 1
    y = x.reshape(n, h, w, cp)[:, ::2, ::2, :].reshape(n * ho * wo, cp)
    return y, (n, ho, wo)


def _shuffle_cat(a, b, c):
    """channel_shuffle(cat(a, b), groups=2) on real channel counts, re-padded."""
    m = a.shape[0]
    out = jnp.stack([a[:, :c], b[:, :c]], axis=-1).reshape(m, 2 * c)
    cp = _ceil_to(2 * c, LANE)
    if cp > 2 * c:
        out = jnp.pad(out, ((0, 0), (0, cp - 2 * c)))
    return out


def branch_forward(x, nhw, dw, pw_out, pw_in=None):
    n, h, w = nhw
    m = n * h * w
    assert x.shape[0] == m
    cp_in = x.shape[1]
    cp_dw = dw['w'].shape[1]
    cp_out = pw_out['w'].shape[1]
    if pw_in is not None:
        assert pw_in['w'].shape[0] == cp_in and pw_in['w'].shape[1] == cp_dw
    else:
        assert cp_dw == cp_in
    masks = _stencil_masks(n, h, w)
    kern = _make_branch_kernel(n, h, w, pre_pw=pw_in is not None)

    inputs = [x]
    specs = [_full_spec((m, cp_in))]
    if pw_in is not None:
        inputs += [pw_in['w'], pw_in['b']]
        specs += [_full_spec(pw_in['w'].shape), _full_spec(pw_in['b'].shape)]
    inputs += [dw['w'], dw['b'], pw_out['w'], pw_out['b'], masks]
    specs += [_full_spec(dw['w'].shape), _full_spec(dw['b'].shape),
              _full_spec(pw_out['w'].shape), _full_spec(pw_out['b'].shape),
              _full_spec(masks.shape)]

    return pl.pallas_call(
        kern,
        out_shape=jax.ShapeDtypeStruct((m, cp_out), jnp.float32),
        grid=(1,),
        in_specs=specs,
        out_specs=_full_spec((m, cp_out)),
        scratch_shapes=[pltpu.VMEM((m + 2 * _halo(w), cp_dw), jnp.float32)],
    )(*inputs)


def maxpool_3x3_s2(x, nhw):
    """3x3 / stride 2 / pad 1 max pool.  Zero halo is exact here because the
    input is post-ReLU (>= 0), so the pad can never exceed the window max."""
    n, h, w = nhw
    m = n * h * w
    cp = x.shape[1]
    masks = _stencil_masks(n, h, w)
    y = pl.pallas_call(
        _make_maxpool_kernel(n, h, w),
        out_shape=jax.ShapeDtypeStruct((m, cp), jnp.float32),
        grid=(1,),
        in_specs=[_full_spec((m, cp)), _full_spec(masks.shape)],
        out_specs=_full_spec((m, cp)),
        scratch_shapes=[pltpu.VMEM((m + 2 * _halo(w), cp), jnp.float32)],
    )(x, masks)
    return _decimate(y, nhw)


def stem_conv(x_nchw, p):
    """conv1: 3x3 dense, stride 2, pad 1 (+BN+ReLU) via a tiny im2col GEMM."""
    x = jnp.transpose(x_nchw.astype(jnp.float32), (0, 2, 3, 1))   # NHWC
    n, h, w, c = x.shape
    ho, wo = (h - 1) // 2 + 1, (w - 1) // 2 + 1
    xp = jnp.pad(x, ((0, 0), (1, 1), (1, 1), (0, 0)))
    taps = [xp[:, dy:dy + 2 * ho - 1:2, dx:dx + 2 * wo - 1:2, :]
            for dy in range(3) for dx in range(3)]
    cols = jnp.stack(taps, axis=3).reshape(n * ho * wo, 9 * c)
    kp = p['w'].shape[0]
    cols = jnp.pad(cols, ((0, 0), (0, kp - 9 * c)))
    return pointwise_conv(cols, p, relu=True), (n, ho, wo)


def block_forward(x, nhw, p):
    bf = p['bf']
    if p['stride'] == 1:
        x1 = x[:, :bf]
        cp_in = _ceil_to(bf, LANE)
        x2 = jnp.pad(x[:, bf:2 * bf], ((0, 0), (0, cp_in - bf)))
        b2 = branch_forward(x2, nhw, p['b2_dw'], p['b2_pw2'], pw_in=p['b2_pw1'])
        return _shuffle_cat(x1, b2, bf), nhw
    else:
        b1 = branch_forward(x, nhw, p['b1_dw'], p['b1_pw'], pw_in=None)
        b2 = branch_forward(x, nhw, p['b2_dw'], p['b2_pw2'], pw_in=p['b2_pw1'])
        b1, nhw2 = _decimate(b1, nhw)
        b2, _ = _decimate(b2, nhw)
        return _shuffle_cat(b1, b2, bf), nhw2


def _task_mask(logits, t, pre, nc_per_task):
    n_outputs = logits.shape[1]
    if pre:
        o1, o2 = 0, int(t * nc_per_task)
    else:
        o1, o2 = int(t * nc_per_task), int((t + 1) * nc_per_task)
    col = jnp.arange(n_outputs)[None, :]
    keep = (col >= o1) & (col < o2)
    return jnp.where(keep, logits, jnp.float32(-1e11))


def reptail_shufflenet_forward(params, x_nchw, t, pre=False, is_con=True,
                               nc_per_task=10):
    y, nhw = stem_conv(x_nchw, params['conv1'])
    y, nhw = maxpool_3x3_s2(y, nhw)
    for stage in params['stages']:
        for blk in stage:
            y, nhw = block_forward(y, nhw, blk)
    y = pointwise_conv(y, params['conv5'], relu=True)
    n, h, w = nhw
    cout = params['conv5']['cout']
    feat = y[:, :cout].reshape(n, h * w, cout).mean(axis=1)
    # TODO(synk): the [N,1024]x[1024,100] head + global pool stay in XLA on
    # purpose -- a pallas_call here would be pure launch overhead.
    logits = jnp.dot(feat, params['last']['w'].T,
                     precision=lax.Precision.HIGHEST) + params['last']['b']
    if is_con:
        logits = _task_mask(logits, t, pre, nc_per_task)
    return logits


# --------------------------------------------------------------------------
# parameter construction: random weights, synthetic BN stats, folded + padded
# --------------------------------------------------------------------------

def _normal(key, shape, scale=1.0):
    return scale * jax.random.normal(key, shape, jnp.float32)


def _bn_init(nk, c):
    return dict(gamma=1.0 + 0.1 * _normal(nk(), (c,)),
                beta=0.1 * _normal(nk(), (c,)),
                mean=0.1 * _normal(nk(), (c,)),
                var=1.0 + 0.1 * jax.random.uniform(nk(), (c,), jnp.float32))


def _fold(bn, eps=1e-5):
    scale = bn['gamma'] / jnp.sqrt(bn['var'] + eps)
    return scale, bn['beta'] - bn['mean'] * scale


def _prep_pw(nk, cin, cout):
    w = _normal(nk(), (cout, cin), 1.0 / np.sqrt(cin))
    scale, bias = _fold(_bn_init(nk, cout))
    wmat = (w * scale[:, None]).T                               # [cin, cout]
    kp, np_ = _ceil_to(cin, LANE), _ceil_to(cout, LANE)
    wp = jnp.zeros((kp, np_), jnp.float32).at[:cin, :cout].set(wmat)
    bp = jnp.zeros((1, np_), jnp.float32).at[0, :cout].set(bias)
    return dict(w=wp.astype(jnp.bfloat16), b=bp, cin=cin, cout=cout)


def _prep_conv3x3(nk, cin, cout):
    w = _normal(nk(), (cout, cin, 3, 3), 1.0 / np.sqrt(cin * 9))
    scale, bias = _fold(_bn_init(nk, cout))
    wmat = (w * scale[:, None, None, None]).transpose(2, 3, 1, 0)
    wmat = wmat.reshape(9 * cin, cout)                          # [(ky*3+kx)*cin+ci, co]
    kp, np_ = _ceil_to(9 * cin, LANE), _ceil_to(cout, LANE)
    wp = jnp.zeros((kp, np_), jnp.float32).at[:9 * cin, :cout].set(wmat)
    bp = jnp.zeros((1, np_), jnp.float32).at[0, :cout].set(bias)
    return dict(w=wp.astype(jnp.bfloat16), b=bp, cin=cin, cout=cout)


def _prep_dw(nk, c):
    w = _normal(nk(), (c, 3, 3), 1.0 / 3.0)
    scale, bias = _fold(_bn_init(nk, c))
    w9 = (w * scale[:, None, None]).transpose(1, 2, 0).reshape(9, c)
    cp = _ceil_to(c, LANE)
    wp = jnp.zeros((9, cp), jnp.float32).at[:, :c].set(w9)      # f32 (VPU path)
    bp = jnp.zeros((1, cp), jnp.float32).at[0, :c].set(bias)
    return dict(w=wp, b=bp, c=c)


def _prep_block(nk, inp, oup, stride):
    bf = oup // 2
    p = dict(stride=stride, inp=inp, oup=oup, bf=bf)
    if stride > 1:
        p['b1_dw'] = _prep_dw(nk, inp)
        p['b1_pw'] = _prep_pw(nk, inp, bf)
        b2_in = inp
    else:
        b2_in = bf
    p['b2_pw1'] = _prep_pw(nk, b2_in, bf)
    p['b2_dw'] = _prep_dw(nk, bf)
    p['b2_pw2'] = _prep_pw(nk, bf, bf)
    return p


def init_params(key, in_ch=3, num_classes=100,
                stages_repeats=(4, 8, 4),
                stages_out_channels=(24, 48, 96, 192, 1024)):
    keys = iter(jax.random.split(key, 2048))
    nk = lambda: next(keys)
    params = dict()
    params['conv1'] = _prep_conv3x3(nk, in_ch, stages_out_channels[0])
    stages = []
    inp = stages_out_channels[0]
    for reps, oup in zip(stages_repeats, stages_out_channels[1:4]):
        blocks = [_prep_block(nk, inp, oup, 2)]
        for _ in range(reps - 1):
            blocks.append(_prep_block(nk, oup, oup, 1))
        inp = oup
        stages.append(blocks)
    params['stages'] = stages
    params['conv5'] = _prep_pw(nk, stages_out_channels[3], stages_out_channels[4])
    fin = stages_out_channels[4]
    params['last'] = dict(w=_normal(nk(), (num_classes, fin), 1.0 / np.sqrt(fin)),
                          b=0.1 * _normal(nk(), (num_classes,)))
    return params


# --------------------------------------------------------------------------
# pure-XLA reference (lax.conv / reduce_window) for correctness checking.
# It consumes the SAME folded weights and mirrors the bf16 quantisation points
# of the MXU path, so only accumulation-order differences remain.
# --------------------------------------------------------------------------

def ref_forward(params, x_nchw, t, pre=False, is_con=True, nc_per_task=10):
    HI = lax.Precision.HIGHEST
    q = lambda a: a.astype(jnp.bfloat16).astype(jnp.float32)

    def pw(x, p, relu=True):
        w = p['w'][:p['cin'], :p['cout']].astype(jnp.float32)
        b = p['b'][0, :p['cout']]
        y = jnp.einsum('nchw,cd->ndhw', q(x), w, precision=HI)
        y = y + b[None, :, None, None]
        return jnp.maximum(y, 0.0) if relu else y

    def dw(x, p, stride):
        c = p['c']
        w = p['w'][:, :c].reshape(3, 3, c).transpose(2, 0, 1)[:, None]
        b = p['b'][0, :c]
        y = lax.conv_general_dilated(x, w, (stride, stride), ((1, 1), (1, 1)),
                                     dimension_numbers=('NCHW', 'OIHW', 'NCHW'),
                                     feature_group_count=c, precision=HI)
        return y + b[None, :, None, None]

    def conv1(x, p):
        cin, cout = p['cin'], p['cout']
        wm = p['w'][:9 * cin, :cout].astype(jnp.float32)
        w = wm.reshape(3, 3, cin, cout).transpose(3, 2, 0, 1)
        b = p['b'][0, :cout]
        y = lax.conv_general_dilated(q(x), w, (2, 2), ((1, 1), (1, 1)),
                                     dimension_numbers=('NCHW', 'OIHW', 'NCHW'),
                                     precision=HI)
        return jnp.maximum(y + b[None, :, None, None], 0.0)

    def maxpool(x):
        return lax.reduce_window(x, -jnp.inf, lax.max, (1, 1, 3, 3),
                                 (1, 1, 2, 2),
                                 ((0, 0), (0, 0), (1, 1), (1, 1)))

    def shuffle(x):
        n, c, h, w = x.shape
        return x.reshape(n, 2, c // 2, h, w).transpose(0, 2, 1, 3, 4)\
                .reshape(n, c, h, w)

    def block(x, p):
        if p['stride'] == 1:
            c = p['bf']
            x1, x2 = x[:, :c], x[:, c:]
            b2 = pw(dw(pw(x2, p['b2_pw1']), p['b2_dw'], 1), p['b2_pw2'])
            out = jnp.concatenate([x1, b2], axis=1)
        else:
            b1 = pw(dw(x, p['b1_dw'], 2), p['b1_pw'])
            b2 = pw(dw(pw(x, p['b2_pw1']), p['b2_dw'], 2), p['b2_pw2'])
            out = jnp.concatenate([b1, b2], axis=1)
        return shuffle(out)

    x = x_nchw.astype(jnp.float32)
    y = maxpool(conv1(x, params['conv1']))
    for stage in params['stages']:
        for blk in stage:
            y = block(y, blk)
    y = pw(y, params['conv5'])
    feat = y.mean(axis=(2, 3))
    logits = jnp.dot(feat, params['last']['w'].T,
                     precision=HI) + params['last']['b']
    if is_con:
        logits = _task_mask(logits, t, pre, nc_per_task)
    return logits


# --------------------------------------------------------------------------

if __name__ == "__main__":
    key = jax.random.PRNGKey(0)
    pkey, xkey = jax.random.split(key)
    N_CLASSES, NC_PER_TASK = 100, 10

    params = init_params(pkey, in_ch=3, num_classes=N_CLASSES)
    # Small image (the real model uses 224x224 ImageNet crops).
    x = jax.random.normal(xkey, (2, 3, 64, 64), jnp.float32)

    # Pallas forward (unmasked) vs XLA reference over all 100 logits.
    raw = jax.block_until_ready(
        reptail_shufflenet_forward(params, x, t=0, is_con=False))
    assert raw.shape == (2, N_CLASSES)
    ref_raw = jax.block_until_ready(ref_forward(params, x, t=0, is_con=False))
    np.testing.assert_allclose(np.asarray(raw), np.asarray(ref_raw),
                               rtol=2e-2, atol=2e-2)

    # Default module semantics (is_con=True): mask classes outside task t's slot.
    out = _task_mask(raw, t=0, pre=False, nc_per_task=NC_PER_TASK)
    ref_masked = jax.block_until_ready(
        ref_forward(params, x, t=0, pre=False, is_con=True,
                    nc_per_task=NC_PER_TASK))
    np.testing.assert_allclose(np.asarray(out), np.asarray(ref_masked),
                               rtol=2e-2, atol=2e-2)
    assert bool(jnp.all(out[:, NC_PER_TASK:] == jnp.float32(-1e11)))
    assert bool(jnp.all(out[:, :NC_PER_TASK] > -1e10))

    print("KERNEL_OK")
</pallas_src>

<mosaic_0001>
module attributes {stable_mosaic.version = 11 : i64} {
  func.func @_pw_relu_kernel(%arg0: i32, %arg1: memref<256x128xf32, #tpu.memory_space<vmem>>, %arg2: memref<128x128xbf16, #tpu.memory_space<vmem>>, %arg3: memref<1x128xf32, #tpu.memory_space<vmem>>, %arg4: memref<256x128xf32, #tpu.memory_space<vmem>>) attributes {dimension_semantics = [#tpu.dimension_semantics<parallel>], iteration_bounds = array<i64: 8>, scalar_prefetch = 0 : i64, scratch_operands = 0 : i64, tpu.core_type = #tpu.core_type<tc>, window_params = [{transform_indices = @transform_0, window_bounds = array<i64: 256, 128>}, {pipeline_mode = #tpu.pipeline_mode<synchronous>, transform_indices = @transform_1, window_bounds = array<i64: 128, 128>}, {pipeline_mode = #tpu.pipeline_mode<synchronous>, transform_indices = @transform_2, window_bounds = array<i64: 1, 128>}, {transform_indices = @transform_3, window_bounds = array<i64: 256, 128>}]} {
    %c0 = arith.constant 0 : index
    %c0_0 = arith.constant 0 : index
    %0 = vector.load %arg1[%c0, %c0_0] : memref<256x128xf32, #tpu.memory_space<vmem>>, vector<256x128xf32>
    %1 = arith.truncf %0 : vector<256x128xf32> to vector<256x128xbf16>
    %c0_1 = arith.constant 0 : index
    %c0_2 = arith.constant 0 : index
    %2 = vector.load %arg2[%c0_1, %c0_2] : memref<128x128xbf16, #tpu.memory_space<vmem>>, vector<128x128xbf16>
    %cst = arith.constant dense<0.000000e+00> : vector<256x128xf32>
    %3 = tpu.matmul %1, %2, %cst {dimension_numbers = #tpu.dot_dimension_numbers<[1], [0], [0], [1], [0, 0, 1, 1], [], []>} : vector<256x128xbf16>, vector<128x128xbf16>, vector<256x128xf32> -> vector<256x128xf32>
    %c0_3 = arith.constant 0 : index
    %c0_4 = arith.constant 0 : index
    %4 = vector.load %arg3[%c0_3, %c0_4] : memref<1x128xf32, #tpu.memory_space<vmem>>, vector<1x128xf32>
    %5 = vector.broadcast %4 : vector<1x128xf32> to vector<256x128xf32>
    %6 = arith.addf %3, %5 : vector<256x128xf32>
    %cst_5 = arith.constant 0.000000e+00 : f32
    %7 = vector.broadcast %cst_5 : f32 to vector<256x128xf32>
    %8 = arith.maximumf %6, %7 : vector<256x128xf32>
    %c0_6 = arith.constant 0 : index
    %c0_7 = arith.constant 0 : index
    %9 = vector.load %arg4[%c0_6, %c0_7] : memref<256x128xf32, #tpu.memory_space<vmem>>, vector<256x128xf32>
    tpu.vector_store %arg4[%c0_6, %c0_7], %8 {strides = array<i32>} : memref<256x128xf32, #tpu.memory_space<vmem>>, vector<256x128xf32>,
    return
  }
  func.func @transform_0(%arg0: i32) -> (i32, i32) {
    %c0_i32 = arith.constant 0 : i32
    %c0_i32_0 = arith.constant 0 : i32
    return %arg0, %c0_i32 : i32, i32
  }
  func.func @transform_1(%arg0: i32) -> (i32, i32) {
    %c0_i32 = arith.constant 0 : i32
    %c0_i32_0 = arith.constant 0 : i32
    %c0_i32_1 = arith.constant 0 : i32
    return %c0_i32, %c0_i32_0 : i32, i32
  }
  func.func @transform_2(%arg0: i32) -> (i32, i32) {
    %c0_i32 = arith.constant 0 : i32
    %c0_i32_0 = arith.constant 0 : i32
    %c0_i32_1 = arith.constant 0 : i32
    return %c0_i32, %c0_i32_0 : i32, i32
  }
  func.func @transform_3(%arg0: i32) -> (i32, i32) {
    %c0_i32 = arith.constant 0 : i32
    %c0_i32_0 = arith.constant 0 : i32
    return %arg0, %c0_i32 : i32, i32
  }
}

</mosaic_0001>

<bundles_post_ra>
// kernel: tpu_custom_call.1
= control target key start
LH: loop header
LB: loop body
LE: loop exit
PB: predicated region body
PF: predicated region fallthrough
CT: control target
= control target key end

     0   :  { %8 = vsyncpa [#allocation3], 0  ;;  %s1295_s0 = inlined_call_operand.hbm [shape: f32[2048,128], index: 0, kind: input, shape index: {}]   ;;  %s1296_s1 = inlined_call_operand.hbm [shape: bf16[128,128], index: 1, kind: input, shape index: {}]   ;;  %s1297_s2 = inlined_call_operand.vmem [shape: f32[1,128], index: 2, kind: input, shape index: {}]   ;;  %s1298_s3 = inlined_call_operand.hbm [shape: f32[2048,128], index: 3, kind: output, shape index: {}]  }
   0x1   :  { %10 = vsyncpa [#allocation3 + $0x1], 0 }
   0x2   :  { %11 = vsyncpa [#allocation6], 0 }
   0x3   :  { %12 = vsyncpa [#allocation4], 0 }
   0x4   :  { %14 = vsyncpa [#allocation4 + $0x1], 0  ;;  %s993_s12 = smov 0   ;;  %s995_s13 = smov 0  }
   0x5   :  { %s997_s14 = smov 0   ;;  %s999_s15 = smov 0  }
   0x6 LB: > { %s1014_s16 = sadd.s32 4294967295, %s962_s15   ;;  %s648_s17 = sadd.s32 4294967294, %s962_s15   ;;  %s962_s15 = sphi %s999_s15, %s1317_s15   ;;  %s958_s14 = sphi %s997_s14, %s1316_s14   ;;  %s954_s13 = sphi %s995_s13, %s1315_s13   ;;  %s950_s12 = sphi %s993_s12, %s1314_s12  }
   0x7   : > { %p40_p0 = scmp.ne.s32.totalorder %s954_s13, %s950_s12  ;;  %p1299_p1 = scmp.eq.s32.totalorder %s1014_s16, 0 }
   0x8   : > { %p112_p3 = scmp.eq.s32.totalorder %s648_s17, 7  ;;  %p649_p5 = scmp.ge.s32.totalorder %s962_s15, 1 }
   0x9   : > { %p1023_p4 = por %p1299_p1, %p40_p0  ;;  %p119_p7 = scmp.lt.s32.totalorder %s962_s15, 9 }
   0xa   : > { %p1028_p6 = por %p112_p3, %p40_p0  ;;  %s964_s21 = smov [#allocation5]  }
   0xb   : > { %s1302_s18 = scalar_select %p1023_p4, 1, 0 }
   0xc   : > { %s1303_s19 = scalar_select %p1028_p6, 1, 0 }
   0xd   : > { %p1033_p8 = pnand %p649_p5, %p119_p7  ;;  %s131_s22 = sshll.u32 %s964_s21, 4  ;;  %s132_s22 = int_to_ptr.vmem [resolvable:$true] %s131_s22 }
   0xe   : > { %s1046_s24 = sadd.s32 1, %s962_s15   ;;  %s27_s25 = sadd.s32 1, %s958_s14 }
   0xf   : > { %s1304_s20 = scalar_select %p1033_p8, 1, 0 }
  0x10   : > { %p771_p9 = pneg %p1033_p8  ;;  %s24_s26 = ssub.s32 %s962_s15, %s1046_s24 }
  0x11   : > { %s834_s29 = scalar_lea.hbm %s1296_s1, 1024 }
  0x12   : > { %p1041_p10 = pnand %p771_p9, %p1299_p1  ;;  %p835_p11 = scmp.ne.s32.totalorder %s1296_s1, %s834_s29 }
  0x13   : > { %p841_p3 = scmp.lt.u32.totalorder %s834_s29, %s1296_s1 }
  0x14   : > { %p836_p12 = pneg %p1041_p10 }
  0x16   : > { %p837_p13 = pnand %p836_p12, %p835_p11 }
  0x18   : > { %p838_p0 = pneg %p837_p13 }
  0x1a   : > { %p843_p5 = pnand %p841_p3, %p838_p0 }
  0x1c   : > { %846 = shalt.err (!%p843_p5)
}
  0x1d   : > { %s847_s7 = scalar_lea.vmem %s132_s22, 1024  ;;  %p855_p2 = scmp.lt.s32.totalorder %s132_s22, %s132_s22 }
  0x1e   : > { %p848_p7 = scmp.ne.s32.totalorder %s132_s22, %s847_s7  ;;  %p856_p6 = scmp.lt.s32.totalorder %s847_s7, %s847_s7 }
  0x20   : > { %p850_p9 = pnand %p848_p7, %p836_p12  ;;  %p857_p4 = por %p856_p6, %p855_p2 }
  0x22   : > { %p851_p1 = pneg %p850_p9 }
  0x24   : > { %p858_p8 = pnand %p857_p4, %p851_p1 }
  0x26   : > { %861 = shalt.err (!%p858_p8)
}
  0x27   : > { %s965_s8 = smov 64   ;;  %s966_s9 = smov 4  }
  0x28   : > { %774 = dma.hbm_to_vmem [thread:$0]  (!%p1041_p10), %s1296_s1, 1024, %s132_s22, [#allocation6], %s965_s8, %s965_s8, %s966_s9  }
  0x29   : > { %p25_p11 = scmp.eq.s32.totalorder %s24_s26, 0  ;;  %p34_p2 = scmp.ne.s32.totalorder %s958_s14, %s954_s13 }
  0x2a   : > { %p35_p1 = scmp.eq.s32.totalorder %s962_s15, 0  ;;  %p784_p4 = scmp.lt.s32.totalorder %s962_s15, 8 }
  0x2b   : > { %s1072_s17 = scalar_select %p25_p11, %s958_s14, %s27_s25  }
  0x2c   : > { %p36_p6 = por %p35_p1, %p34_p2  ;;  %p1306_p8 = scmp.eq.s32.totalorder %s1014_s16, 7 }
  0x2d   : > { %s148_s27 = sand.u32 1, %s958_s14   ;;  %s673_s28 = sshll.u32 %s962_s15, 12 }
  0x2e   : > { %p1076_p12 = por %p1306_p8, %p34_p2  ;;  %s652_s29 = sshll.u32 %s148_s27, 8 }
  0x2f   : > { %s1085_s4 = scalar_lea.hbm %s1295_s0, %s673_s28  ;;  %s152_s22 = scalar_lea.vmem [#allocation2], %s652_s29 }
  0x30   : > { %s159_s25 = sshll.u32 %s152_s22, 4  ;;  %p1087_p10 = pnand %p784_p4, %p36_p6  ;;  %s1091_s25 = int_to_ptr.vmem [resolvable:$true] %s159_s25 }
  0x31   : > { %s1093_s5 = scalar_lea.sflag [#allocation3], %s148_s27  ;;  %s862_s6 = scalar_lea.hbm %s1085_s4, 4096 }
  0x32   : > { %p863_p13 = scmp.ne.s32.totalorder %s1085_s4, %s862_s6  ;;  %p864_p0 = pneg %p1087_p10 }
  0x33   : > { %s867_s9 = scalar_lea.hbm %s1295_s0, 32768  ;;  %p868_p7 = scmp.lt.u32.totalorder %s1085_s4, %s1295_s0 }
  0x34   : > { %p865_p3 = pnand %p864_p0, %p863_p13  ;;  %p869_p9 = scmp.lt.u32.totalorder %s867_s9, %s862_s6 }
  0x35   : > { %p871_p2 = scmp.lt.u32.totalorder %s862_s6, %s1085_s4 }
  0x36   : > { %p866_p5 = pneg %p865_p3  ;;  %p870_p11 = por %p869_p9, %p868_p7 }
  0x38   : > { %p872_p1 = por %p871_p2, %p870_p11 }
  0x3a   : > { %p873_p4 = pnand %p872_p1, %p866_p5 }
  0x3c   : > { %876 = shalt.err (!%p873_p4)
}
  0x3d   : > { %s877_s27 = scalar_lea.vmem %s1091_s25, 4096  ;;  %s967_s28 = smov [#allocation2]  }
  0x3e   : > { %p878_p6 = scmp.ne.s32.totalorder %s1091_s25, %s877_s27  ;;  %s882_s29 = sshll.u32 %s967_s28, 4  ;;  %s883_s29 = int_to_ptr.vmem [resolvable:$false] %s882_s29 }
  0x3f   : > { %s884_s23 = scalar_lea.vmem %s883_s29, 8192  ;;  %p885_p3 = scmp.lt.s32.totalorder %s1091_s25, %s883_s29 }
  0x40   : > { %p880_p8 = pnand %p878_p6, %p864_p0  ;;  %p886_p7 = scmp.lt.s32.totalorder %s884_s23, %s877_s27 }
  0x42   : > { %p881_p13 = pneg %p880_p8  ;;  %p887_p9 = por %p886_p7, %p885_p3 }
  0x44   : > { %p888_p11 = pnand %p887_p9, %p881_p13 }
  0x46   : > { %891 = shalt.err (!%p888_p11)
}
  0x47   : > { %s968_s30 = smov 128   ;;  %s969_s22 = smov 8  }
  0x48   : > { %778 = dma.hbm_to_vmem [thread:$0]  (!%p1087_p10), %s1085_s4, 4096, %s1091_s25, %s1093_s5, %s968_s30, %s968_s30, %s969_s22  }
  0x49   : > { %p1309_p0 = scmp.ne.s32.totalorder %s1304_s20, 0 }
  0x4a   : > { %s1124_s6 = sand.u32 (!%p1309_p0), 1, %s954_s13   ;;  %p1310_p5 = scmp.ne.s32.totalorder (!%p1309_p0), %s1302_s18, 0 }
  0x4b   : > { %171 = sbr.rel (%p1309_p0) target bundleno = 377 (0x179), region = 32  ;;  %s656_s7 = sshll.u32 (!%p1309_p0), %s1124_s6, 8 }
  0x4c   : > { %s174_s8 = scalar_lea.sflag (!%p1309_p0), [#allocation3], %s1124_s6  ;;  %s1130_s9 = scalar_lea.vmem (!%p1309_p0), [#allocation2], %s656_s7 }
  0x52   : > { %937 = dma.done.wait (%p1310_p5), %s174_s8, 4096  }
  0x53   : > { %939 = vsyncadd (%p1310_p5), %s174_s8, 4294963200  ;;  %p1311_p10 = scmp.eq.s32.totalorder %s1014_s16, 0 }
  0x55   : > { %941 = dma.done.wait (%p1311_p10), [#allocation6], 1024   ;;  %p1312_p2 = pmov %p1311_p10 }
  0x56   : > { %v826_v0 = vld [vmem:[#allocation5] sm:$0xff]   ;;  %v827_v1 = vld [vmem:[#allocation5 + $0x8] sm:$0xff]   ;;  %v828_v2 = vld [vmem:[#allocation5 + $0x10] sm:$0xff]   ;;  %s1187_s4 = scalar_lea.vmem [#allocation7], %s656_s7  ;;  %s674_s25 = sshll.u32 %s1014_s16, 12 }
  0x57   : > { %943 = vsyncadd (%p1312_p2), [#allocation6], 4294966272  ;;  %699 = vmatprep.subr.bf16.mxu0 %v826_v0  ;;  %747 = vmatprep.subr.bf16.mxu1 %v826_v0  ;;  %v829_v3 = vld [vmem:[#allocation5 + $0x18] sm:$0xff]   ;;  %v207_v4 = vld [vmem:[%s1130_s9] sm:$0xff]  ;;  %s565_s26 = sshll.u32 %s1187_s4, 4  ;;  %s1244_s10 = scalar_lea.hbm %s1298_s3, %s674_s25  ;;  %s1246_s26 = int_to_ptr.vmem [resolvable:$true] %s565_s26 }
  0x58   : > { %700 = vmatpush3.bf16.msra.mxu0 %v826_v0  ;;  %755 = vmatpush3.bf16.msra.mxu1 %v826_v0  ;;  %v208_v5 = vld [vmem:[%s1130_s9 + $0x8] sm:$0xff]  ;;  %v223_v6 = vld [vmem:[%s1130_s9 + $0x80] sm:$0xff]  ;;  %v832_v12 = vld [vmem:[#allocation5 + $0x30] sm:$0xff]   ;;  %s552_s11 = scalar_lea.sflag [#allocation4], %s1124_s6  ;;  %s892_s27 = scalar_lea.vmem %s1246_s26, 4096 }
  0x59   : > { %701 = vmatprep.subr.bf16.mxu0 %v827_v1  ;;  %748 = vmatprep.subr.bf16.mxu1 %v827_v1  ;;  %v239_v7 = vpack.c.bf16 %v208_v5, %v207_v4  ;;  %v224_v8 = vld [vmem:[%s1130_s9 + $0x88] sm:$0xff]  ;;  %v830_v10 = vld [vmem:[#allocation5 + $0x20] sm:$0xff]   ;;  %v833_v13 = vld [vmem:[#allocation5 + $0x38] sm:$0xff]   ;;  %p893_p1 = scmp.ne.s32.totalorder %s1246_s26, %s892_s27  ;;  %s970_s28 = smov [#allocation7]  }
  0x5a   : > { %v247_v9 = vpack.c.bf16 %v224_v8, %v223_v6  ;;  %v831_v11 = vld [vmem:[#allocation5 + $0x28] sm:$0xff]   ;;  %v209_v14 = vld [vmem:[%s1130_s9 + $0x10] sm:$0xff]  ;;  %v210_v15 = vld [vmem:[%s1130_s9 + $0x18] sm:$0xff]  ;;  %s896_s29 = sshll.u32 %s970_s28, 4  ;;  %s897_s29 = int_to_ptr.vmem [resolvable:$false] %s896_s29 }
  0x5b   : > { %715 = vmatprep.mubr.bf16.mxu0 %v239_v7  ;;  %v225_v16 = vld [vmem:[%s1130_s9 + $0x90] sm:$0xff]  ;;  %v226_v17 = vld [vmem:[%s1130_s9 + $0x98] sm:$0xff]  ;;  %v211_v18 = vld [vmem:[%s1130_s9 + $0x20] sm:$0xff]  ;;  %v240_v22 = vpack.c.bf16 %v210_v15, %v209_v14  ;;  %p894_p4 = pnand %p893_p1, %p1076_p12  ;;  %s898_s23 = scalar_lea.vmem %s897_s29, 8192 }
  0x5c   : > { %702 = vmatpush3.bf16.msra.mxu0 %v827_v1  ;;  %756 = vmatpush3.bf16.msra.mxu1 %v827_v1  ;;  %v212_v19 = vld [vmem:[%s1130_s9 + $0x28] sm:$0xff]  ;;  %v227_v20 = vld [vmem:[%s1130_s9 + $0xa0] sm:$0xff]  ;;  %v248_v23 = vpack.c.bf16 %v226_v17, %v225_v16  ;;  %v213_v26 = vld [vmem:[%s1130_s9 + $0x30] sm:$0xff]  ;;  %p899_p8 = scmp.lt.s32.totalorder %s1246_s26, %s897_s29  ;;  %p900_p13 = scmp.lt.s32.totalorder %s898_s23, %s892_s27 }
  0x5d   : > { %703 = vmatprep.subr.bf16.mxu0 %v828_v2  ;;  %749 = vmatprep.subr.bf16.mxu1 %v828_v2  ;;  %v228_v21 = vld [vmem:[%s1130_s9 + $0xa8] sm:$0xff]  ;;  %v241_v24 = vpack.c.bf16 %v212_v19, %v211_v18  ;;  %v214_v27 = vld [vmem:[%s1130_s9 + $0x38] sm:$0xff]  ;;  %v229_v28 = vld [vmem:[%s1130_s9 + $0xb0] sm:$0xff]  ;;  %p895_p6 = pneg %p894_p4 }
  0x5e   : > { %731 = vmatprep.mubr.bf16.mxu1 %v247_v9  ;;  %v249_v25 = vpack.c.bf16 %v228_v21, %v227_v20  ;;  %v230_v29 = vld [vmem:[%s1130_s9 + $0xb8] sm:$0xff]  ;;  %v215_v30 = vld [vmem:[%s1130_s9 + $0x40] sm:$0xff]  ;;  %v216_v31 = vld [vmem:[%s1130_s9 + $0x48] sm:$0xff]  ;;  %v242_v34 = vpack.c.bf16 %v214_v27, %v213_v26  ;;  %p901_p3 = por %p900_p13, %p899_p8 }
  0x5f   : > { %v231_v32 = vld [vmem:[%s1130_s9 + $0xc0] sm:$0xff]  ;;  %v232_v33 = vld [vmem:[%s1130_s9 + $0xc8] sm:$0xff]  ;;  %v250_v35 = vpack.c.bf16 %v230_v29, %v229_v28  ;;  %v243_v36 = vpack.c.bf16 %v216_v31, %v215_v30  ;;  %v217_v38 = vld [vmem:[%s1130_s9 + $0x50] sm:$0xff] }
  0x60   : > { %704 = vmatpush3.bf16.msra.mxu0 %v828_v2  ;;  %757 = vmatpush3.bf16.msra.mxu1 %v828_v2  ;;  %v251_v37 = vpack.c.bf16 %v232_v33, %v231_v32  ;;  %v218_v39 = vld [vmem:[%s1130_s9 + $0x58] sm:$0xff]  ;;  %v233_v40 = vld [vmem:[%s1130_s9 + $0xd0] sm:$0xff]  ;;  %v219_v42 = vld [vmem:[%s1130_s9 + $0x60] sm:$0xff]  ;;  %p902_p7 = pnand %p901_p3, %p895_p6 }
  0x61   : > { %705 = vmatprep.subr.bf16.mxu0 %v829_v3  ;;  %750 = vmatprep.subr.bf16.mxu1 %v829_v3  ;;  %v234_v41 = vld [vmem:[%s1130_s9 + $0xd8] sm:$0xff]  ;;  %v220_v43 = vld [vmem:[%s1130_s9 + $0x68] sm:$0xff]  ;;  %v235_v44 = vld [vmem:[%s1130_s9 + $0xe0] sm:$0xff]  ;;  %v244_v46 = vpack.c.bf16 %v218_v39, %v217_v38 }
  0x62   : > { %v236_v45 = vld [vmem:[%s1130_s9 + $0xe8] sm:$0xff]  ;;  %v252_v47 = vpack.c.bf16 %v234_v41, %v233_v40  ;;  %v245_v48 = vpack.c.bf16 %v220_v43, %v219_v42  ;;  %v221_v50 = vld [vmem:[%s1130_s9 + $0x70] sm:$0xff]  ;;  %v222_v51 = vld [vmem:[%s1130_s9 + $0x78] sm:$0xff] }
  0x63   : > { %v253_v49 = vpack.c.bf16 %v236_v45, %v235_v44  ;;  %v237_v52 = vld [vmem:[%s1130_s9 + $0xf0] sm:$0xff]  ;;  %v238_v53 = vld [vmem:[%s1130_s9 + $0xf8] sm:$0xff]  ;;  %v246_v54 = vpack.c.bf16 %v222_v51, %v221_v50  ;;  %v1175_v56 = vld [vmem:[%s1297_s2] ss:$0 sm:$0xff] }
  0x64   : > { %706 = vmatpush3.bf16.msra.mxu0 %v829_v3  ;;  %758 = vmatpush3.bf16.msra.mxu1 %v829_v3  ;;  %v254_v55 = vpack.c.bf16 %v238_v53, %v237_v52 }
  0x65   : > { %707 = vmatprep.subr.bf16.mxu0 %v830_v10  ;;  %751 = vmatprep.subr.bf16.mxu1 %v830_v10 }
  0x68   : > { %708 = vmatpush3.bf16.msra.mxu0 %v830_v10  ;;  %759 = vmatpush3.bf16.msra.mxu1 %v830_v10 }
  0x69   : > { %709 = vmatprep.subr.bf16.mxu0 %v831_v11  ;;  %752 = vmatprep.subr.bf16.mxu1 %v831_v11 }
  0x6c   : > { %710 = vmatpush3.bf16.msra.mxu0 %v831_v11  ;;  %760 = vmatpush3.bf16.msra.mxu1 %v831_v11 }
  0x6d   : > { %711 = vmatprep.subr.bf16.mxu0 %v832_v12  ;;  %753 = vmatprep.subr.bf16.mxu1 %v832_v12 }
  0x70   : > { %712 = vmatpush3.bf16.msra.mxu0 %v832_v12  ;;  %761 = vmatpush3.bf16.msra.mxu1 %v832_v12 }
  0x71   : > { %713 = vmatprep.subr.bf16.mxu0 %v833_v13  ;;  %754 = vmatprep.subr.bf16.mxu1 %v833_v13 }
  0x74   : > { %714 = vmatpush3.bf16.msra.mxu0 %v833_v13  ;;  %762 = vmatpush3.bf16.msra.mxu1 %v833_v13 }
  0x77   : > { %716 = vmatmul.mubr.bf16.vlgmr.msra.gmra.mrb[0].mxu0 %v240_v22  ;;  %732 = vmatmul.mubr.bf16.vlgmr.msra.gmra.mrb[0].mxu1 %v248_v23 }
  0x78   : > { %719 = vmatprep.mubr.bf16.mxu0 %v241_v24  ;;  %735 = vmatprep.mubr.bf16.mxu1 %v249_v25 }
  0x7f   : > { %720 = vmatmul.mubr.bf16.gmra.mrb[4].mxu0 %v242_v34  ;;  %736 = vmatmul.mubr.bf16.gmra.mrb[4].mxu1 %v250_v35 }
  0x80   : > { %723 = vmatprep.mubr.bf16.mxu0 %v243_v36  ;;  %739 = vmatprep.mubr.bf16.mxu1 %v251_v37 }
  0x87   : > { %724 = vmatmul.mubr.bf16.gmra.mrb[8].mxu0 %v244_v46  ;;  %740 = vmatmul.mubr.bf16.gmra.mrb[8].mxu1 %v252_v47 }
  0x88   : > { %727 = vmatprep.mubr.bf16.mxu0 %v245_v48  ;;  %743 = vmatprep.mubr.bf16.mxu1 %v253_v49 }
  0x8f   : > { %728 = vmatmul.mubr.bf16.gmra.mrb[12].mxu0 %v246_v54  ;;  %744 = vmatmul.mubr.bf16.gmra.mrb[12].mxu1 %v254_v55 }
 0x14a   : > { %v717_v57 = vpop.f32.mrb[0].mxu0  ;;  %v733_v58 = vpop.f32.mrb[0].mxu1 }
 0x14b   : > { %v369_v59 = vadd.f32 %v717_v57, %v1175_v56  ;;  %v433_v60 = vadd.f32 %v733_v58, %v1175_v56  ;;  %v360_v61 = vpop.f32.mrb[1].mxu0  ;;  %v424_v62 = vpop.f32.mrb[1].mxu1 }
 0x14c   : > { %v361_v63 = vadd.f32 %v1175_v56, %v360_v61  ;;  %v425_v0 = vadd.f32 %v1175_v56, %v424_v62  ;;  %v718_v1 = vpop.f32.mrb[2].mxu0  ;;  %v734_v2 = vpop.f32.mrb[2].mxu1 }
 0x14d   : > { %v489_v3 = vmax.f32 %v369_v59, 0.0  ;;  %v505_v4 = vmax.f32 %v433_v60, 0.0  ;;  %v372_v5 = vadd.f32 %v718_v1, %v1175_v56  ;;  %v436_v6 = vadd.f32 %v734_v2, %v1175_v56  ;;  %v363_v7 = vpop.f32.mrb[3].mxu0  ;;  %v427_v8 = vpop.f32.mrb[3].mxu1 }
 0x14e   : > { %v487_v9 = vmax.f32 %v361_v63, 0.0  ;;  %v503_v10 = vmax.f32 %v425_v0, 0.0  ;;  %v364_v11 = vadd.f32 %v1175_v56, %v363_v7  ;;  %v428_v12 = vadd.f32 %v1175_v56, %v427_v8 }
 0x14f   : > { %521 = vst [vmem:[%s1187_s4 + $0x10] sm:$0xff] %v489_v3  ;;  %537 = vst [vmem:[%s1187_s4 + $0x90] sm:$0xff] %v505_v4  ;;  %v490_v13 = vmax.f32 %v372_v5, 0.0  ;;  %v506_v14 = vmax.f32 %v436_v6, 0.0 }
 0x150   : > { %519 = vst [vmem:[%s1187_s4] sm:$0xff] %v487_v9  ;;  %535 = vst [vmem:[%s1187_s4 + $0x80] sm:$0xff] %v503_v10  ;;  %v488_v15 = vmax.f32 %v364_v11, 0.0  ;;  %v504_v16 = vmax.f32 %v428_v12, 0.0 }
 0x151   : > { %522 = vst [vmem:[%s1187_s4 + $0x18] sm:$0xff] %v490_v13  ;;  %538 = vst [vmem:[%s1187_s4 + $0x98] sm:$0xff] %v506_v14 }
 0x152   : > { %520 = vst [vmem:[%s1187_s4 + $0x8] sm:$0xff] %v488_v15  ;;  %536 = vst [vmem:[%s1187_s4 + $0x88] sm:$0xff] %v504_v16  ;;  %v721_v17 = vpop.f32.mrb[4].mxu0  ;;  %v737_v18 = vpop.f32.mrb[4].mxu1 }
 0x153   : > { %v385_v19 = vadd.f32 %v721_v17, %v1175_v56  ;;  %v449_v20 = vadd.f32 %v737_v18, %v1175_v56  ;;  %v376_v21 = vpop.f32.mrb[5].mxu0  ;;  %v440_v22 = vpop.f32.mrb[5].mxu1 }
 0x154   : > { %v377_v23 = vadd.f32 %v1175_v56, %v376_v21  ;;  %v441_v24 = vadd.f32 %v1175_v56, %v440_v22  ;;  %v722_v25 = vpop.f32.mrb[6].mxu0  ;;  %v738_v26 = vpop.f32.mrb[6].mxu1 }
 0x155   : > { %v493_v27 = vmax.f32 %v385_v19, 0.0  ;;  %v509_v28 = vmax.f32 %v449_v20, 0.0  ;;  %v388_v29 = vadd.f32 %v722_v25, %v1175_v56  ;;  %v452_v30 = vadd.f32 %v738_v26, %v1175_v56  ;;  %v379_v31 = vpop.f32.mrb[7].mxu0  ;;  %v443_v32 = vpop.f32.mrb[7].mxu1 }
 0x156   : > { %v491_v33 = vmax.f32 %v377_v23, 0.0  ;;  %v507_v34 = vmax.f32 %v441_v24, 0.0  ;;  %v380_v35 = vadd.f32 %v1175_v56, %v379_v31  ;;  %v444_v36 = vadd.f32 %v1175_v56, %v443_v32 }
 0x157   : > { %525 = vst [vmem:[%s1187_s4 + $0x30] sm:$0xff] %v493_v27  ;;  %541 = vst [vmem:[%s1187_s4 + $0xb0] sm:$0xff] %v509_v28  ;;  %v494_v37 = vmax.f32 %v388_v29, 0.0  ;;  %v510_v38 = vmax.f32 %v452_v30, 0.0 }
 0x158   : > { %523 = vst [vmem:[%s1187_s4 + $0x20] sm:$0xff] %v491_v33  ;;  %539 = vst [vmem:[%s1187_s4 + $0xa0] sm:$0xff] %v507_v34  ;;  %v492_v39 = vmax.f32 %v380_v35, 0.0  ;;  %v508_v40 = vmax.f32 %v444_v36, 0.0 }
 0x159   : > { %526 = vst [vmem:[%s1187_s4 + $0x38] sm:$0xff] %v494_v37  ;;  %542 = vst [vmem:[%s1187_s4 + $0xb8] sm:$0xff] %v510_v38 }
 0x15a   : > { %524 = vst [vmem:[%s1187_s4 + $0x28] sm:$0xff] %v492_v39  ;;  %540 = vst [vmem:[%s1187_s4 + $0xa8] sm:$0xff] %v508_v40  ;;  %v725_v41 = vpop.f32.mrb[8].mxu0  ;;  %v741_v42 = vpop.f32.mrb[8].mxu1 }
 0x15b   : > { %v401_v43 = vadd.f32 %v725_v41, %v1175_v56  ;;  %v465_v44 = vadd.f32 %v741_v42, %v1175_v56  ;;  %v392_v45 = vpop.f32.mrb[9].mxu0  ;;  %v456_v46 = vpop.f32.mrb[9].mxu1 }
 0x15c   : > { %v393_v47 = vadd.f32 %v1175_v56, %v392_v45  ;;  %v457_v48 = vadd.f32 %v1175_v56, %v456_v46  ;;  %v726_v49 = vpop.f32.mrb[10].mxu0  ;;  %v742_v50 = vpop.f32.mrb[10].mxu1 }
 0x15d   : > { %v497_v51 = vmax.f32 %v401_v43, 0.0  ;;  %v513_v52 = vmax.f32 %v465_v44, 0.0  ;;  %v404_v53 = vadd.f32 %v726_v49, %v1175_v56  ;;  %v468_v54 = vadd.f32 %v742_v50, %v1175_v56  ;;  %v395_v55 = vpop.f32.mrb[11].mxu0  ;;  %v459_v57 = vpop.f32.mrb[11].mxu1 }
 0x15e   : > { %v495_v58 = vmax.f32 %v393_v47, 0.0  ;;  %v511_v59 = vmax.f32 %v457_v48, 0.0  ;;  %v396_v60 = vadd.f32 %v1175_v56, %v395_v55  ;;  %v460_v61 = vadd.f32 %v1175_v56, %v459_v57 }
 0x15f   : > { %529 = vst [vmem:[%s1187_s4 + $0x50] sm:$0xff] %v497_v51  ;;  %545 = vst [vmem:[%s1187_s4 + $0xd0] sm:$0xff] %v513_v52  ;;  %v498_v62 = vmax.f32 %v404_v53, 0.0  ;;  %v514_v63 = vmax.f32 %v468_v54, 0.0 }
 0x160   : > { %527 = vst [vmem:[%s1187_s4 + $0x40] sm:$0xff] %v495_v58  ;;  %543 = vst [vmem:[%s1187_s4 + $0xc0] sm:$0xff] %v511_v59  ;;  %v496_v0 = vmax.f32 %v396_v60, 0.0  ;;  %v512_v1 = vmax.f32 %v460_v61, 0.0 }
 0x161   : > { %530 = vst [vmem:[%s1187_s4 + $0x58] sm:$0xff] %v498_v62  ;;  %546 = vst [vmem:[%s1187_s4 + $0xd8] sm:$0xff] %v514_v63 }
 0x162   : > { %528 = vst [vmem:[%s1187_s4 + $0x48] sm:$0xff] %v496_v0  ;;  %544 = vst [vmem:[%s1187_s4 + $0xc8] sm:$0xff] %v512_v1  ;;  %v729_v2 = vpop.f32.mrb[12].mxu0  ;;  %v745_v3 = vpop.f32.mrb[12].mxu1 }
 0x163   : > { %v417_v4 = vadd.f32 %v729_v2, %v1175_v56  ;;  %v481_v5 = vadd.f32 %v745_v3, %v1175_v56  ;;  %v408_v6 = vpop.f32.mrb[13].mxu0  ;;  %v472_v7 = vpop.f32.mrb[13].mxu1 }
 0x164   : > { %v409_v8 = vadd.f32 %v1175_v56, %v408_v6  ;;  %v473_v9 = vadd.f32 %v1175_v56, %v472_v7  ;;  %v730_v10 = vpop.f32.mrb[14].mxu0  ;;  %v746_v11 = vpop.f32.mrb[14].mxu1 }
 0x165   : > { %v501_v12 = vmax.f32 %v417_v4, 0.0  ;;  %v517_v13 = vmax.f32 %v481_v5, 0.0  ;;  %v420_v14 = vadd.f32 %v730_v10, %v1175_v56  ;;  %v484_v15 = vadd.f32 %v746_v11, %v1175_v56  ;;  %v411_v16 = vpop.f32.mrb[15].mxu0  ;;  %v475_v17 = vpop.f32.mrb[15].mxu1 }
 0x166   : > { %v499_v18 = vmax.f32 %v409_v8, 0.0  ;;  %v515_v19 = vmax.f32 %v473_v9, 0.0  ;;  %v412_v20 = vadd.f32 %v1175_v56, %v411_v16  ;;  %v476_v21 = vadd.f32 %v1175_v56, %v475_v17 }
 0x167   : > { %533 = vst [vmem:[%s1187_s4 + $0x70] sm:$0xff] %v501_v12  ;;  %549 = vst [vmem:[%s1187_s4 + $0xf0] sm:$0xff] %v517_v13  ;;  %v502_v22 = vmax.f32 %v420_v14, 0.0  ;;  %v518_v23 = vmax.f32 %v484_v15, 0.0 }
 0x168   : > { %531 = vst [vmem:[%s1187_s4 + $0x60] sm:$0xff] %v499_v18  ;;  %547 = vst [vmem:[%s1187_s4 + $0xe0] sm:$0xff] %v515_v19  ;;  %v500_v24 = vmax.f32 %v412_v20, 0.0  ;;  %v516_v25 = vmax.f32 %v476_v21, 0.0 }
 0x169   : > { %534 = vst [vmem:[%s1187_s4 + $0x78] sm:$0xff] %v502_v22  ;;  %550 = vst [vmem:[%s1187_s4 + $0xf8] sm:$0xff] %v518_v23 }
 0x16a   : > { %532 = vst [vmem:[%s1187_s4 + $0x68] sm:$0xff] %v500_v24  ;;  %548 = vst [vmem:[%s1187_s4 + $0xe8] sm:$0xff] %v516_v25 }
 0x16b   : > { %905 = shalt.err (!%p902_p7)
}
 0x16c   : > { %s906_s30 = scalar_lea.hbm %s1244_s10, 4096  ;;  %s910_s8 = scalar_lea.hbm %s1298_s3, 32768 }
 0x16d   : > { %p907_p9 = scmp.ne.s32.totalorder %s1244_s10, %s906_s30  ;;  %p911_p5 = scmp.lt.u32.totalorder %s1244_s10, %s1298_s3 }
 0x16e   : > { %p912_p10 = scmp.lt.u32.totalorder %s910_s8, %s906_s30  ;;  %p914_p1 = scmp.lt.u32.totalorder %s906_s30, %s1244_s10 }
 0x16f   : > { %p908_p11 = pnand %p907_p9, %p1076_p12 }
 0x170   : > { %p913_p2 = por %p912_p10, %p911_p5 }
 0x171   : > { %p909_p0 = pneg %p908_p11 }
 0x172   : > { %p915_p4 = por %p914_p1, %p913_p2 }
 0x174   : > { %p916_p6 = pnand %p915_p4, %p909_p0 }
 0x176   : > { %919 = shalt.err (!%p916_p6)
}
 0x177   : > { %s971_s20 = smov 128   ;;  %s972_s4 = smov 8  }
 0x178   : > { %769 = dma.vmem_to_hbm [thread:$0]  (%p1076_p12), %s1246_s26, 4096, %s1244_s10, %s552_s11, %s971_s20, %s971_s20, %s972_s4  }
 0x179 PF: > { %p786_p8 = scmp.ge.s32.totalorder %s962_s15, 2  ;;  %s580_s25 = sand.u32 1, %s950_s12  }
 0x17a   : > { %p1313_p13 = scmp.ne.s32.totalorder %s1303_s19, 0  ;;  %s581_s16 = scalar_lea.sflag [#allocation4], %s580_s25 }
 0x17c   : > { %p780_p3 = pnand %p786_p8, %p1313_p13 }
 0x17e   : > { %945 = dma.done.wait (!%p780_p3), %s581_s16, 4096  }
 0x17f   : > { %947 = vsyncadd (!%p780_p3), %s581_s16, 4294963200  ;;  %p17_p7 = scmp.ge.s32.totalorder %s1046_s24, 10   ;;  %s1314_s12 = smov %s954_s13 }
 0x180   : > { %s1315_s13 = smov %s958_s14  ;;  %s1316_s14 = smov %s1072_s17 }
 0x181   : > { %s1317_s15 = smov %s1046_s24  ;;  %19 = sbr.rel (!%p17_p7) target bundleno = 6 (0x6), region = 81 }
 0x188   :  { %586 = vsyncpa [#allocation3], 1 }
 0x189   :  { %588 = vsyncpa [#allocation3 + $0x1], 1 }
 0x18a   :  { %589 = vsyncpa [#allocation6], 1 }
 0x18b   :  { %590 = vsyncpa [#allocation4], 1 }
 0x18c   :  { %592 = vsyncpa [#allocation4 + $0x1], 1 }

</bundles_post_ra>
